<compile_context>
chip_gen: v5e
topology: v5e:2x2
jax: 0.10.0
libtpu: 0.0.40
codegen_flags: <defaults>
</compile_context>

<pallas_src>
import functools

import jax
import jax.numpy as jnp
from jax import lax
from jax.experimental import pallas as pl
from jax.experimental.pallas import tpu as pltpu

INPUT_DIM = 4
HIDDEN = 32
OUT_DIM = 30
GATES = 4 * HIDDEN     # 128 == one full lane width
OUT_PAD = 128          # fc output padded to one full lane width

# Row offsets inside the packed parameter array (all sublane(8)-aligned).
R_WIH = 0                    # rows  0..3  : weight_ih_l0.T      (4, 128), g-block x2
R_WHH = 8                    # rows  8..39 : weight_hh_l0.T      (32, 128), g-block x2
R_B = R_WHH + HIDDEN         # row   40    : bias_ih + bias_hh   (1, 128), g-block x2
R_WFC = 48                   # rows 48..79 : fc.weight.T, lane-padded (32, 128)
R_BFC = R_WFC + HIDDEN       # row   80    : fc.bias, lane-padded (1, 128)
PROWS = 88                   # total rows, padded to a multiple of 8


def make_kernel(T: int, BP: int):
    """LSTM (PyTorch gate order i,f,g,o) + Linear + sigmoid, all in VMEM/vregs."""

    def kernel(x_ref, p_ref, out_ref):
        # x_ref  : (T*BP, INPUT_DIM)   time-major, batch padded to BP rows per step
        # p_ref  : (PROWS, 128)        packed/pre-scaled parameters (see offsets above)
        # out_ref: (BP, OUT_PAD)

        # ---- unpack parameters: static, sublane-aligned slices of one packed ref ----
        w_ih = p_ref[R_WIH:R_WIH + INPUT_DIM, :]    # (4, 128)
        w_hh = p_ref[R_WHH:R_WHH + HIDDEN, :]       # (32, 128)
        b = p_ref[R_B:R_B + 1, :]                   # (1, 128)
        w_fc = p_ref[R_WFC:R_WFC + HIDDEN, :]       # (32, 128)
        b_fc = p_ref[R_BFC:R_BFC + 1, :]            # (1, 128)

        # ---- hoisted input projection for all timesteps (off the serial chain) ----
        # Kept as a value in vregs: T*BP/8 vregs (8 vregs for T=8, BP=8).
        gx = jnp.dot(x_ref[...], w_ih, preferred_element_type=jnp.float32) + b

        h = jnp.zeros((BP, HIDDEN), jnp.float32)
        c = jnp.zeros((BP, HIDDEN), jnp.float32)

        # ---- fully-unrolled recurrence: static, vreg-aligned slices of gx ----
        for t in range(T):
            g_x = gx[t * BP:(t + 1) * BP, :]                             # (BP, 128)
            gates = g_x + jnp.dot(h, w_hh, preferred_element_type=jnp.float32)
            sig = jax.nn.sigmoid(gates)          # single 128-lane EUP pass per step
            i_g = sig[:, 0 * HIDDEN:1 * HIDDEN]
            f_g = sig[:, 1 * HIDDEN:2 * HIDDEN]
            # g-gate pre-activation was pre-scaled by 2 -> 2*sigmoid(2x)-1 == tanh(x)
            g_g = 2.0 * sig[:, 2 * HIDDEN:3 * HIDDEN] - 1.0
            o_g = sig[:, 3 * HIDDEN:4 * HIDDEN]
            c = f_g * c + i_g * g_g
            h = o_g * jnp.tanh(c)

        logits = jnp.dot(h, w_fc, preferred_element_type=jnp.float32) + b_fc
        out_ref[...] = jax.nn.sigmoid(logits)

    return kernel


def prepare_params(params):
    """One-time parameter prep (do NOT call per forward):
    transpose, combine biases, fold the x2 tanh->sigmoid rewrite into the g-gate
    block, zero-pad fc to 128 lanes, and pack everything into one (PROWS, 128)
    array so the kernel needs a single parameter DMA."""
    g_scale = jnp.ones((GATES,), jnp.float32).at[2 * HIDDEN:3 * HIDDEN].set(2.0)
    w_ih_t = params["w_ih"].T * g_scale                    # (4, 128)
    w_hh_t = params["w_hh"].T * g_scale                    # (32, 128)
    b = (params["b_ih"] + params["b_hh"]) * g_scale        # (128,)
    packed = jnp.zeros((PROWS, GATES), jnp.float32)
    packed = packed.at[R_WIH:R_WIH + INPUT_DIM, :].set(w_ih_t)
    packed = packed.at[R_WHH:R_WHH + HIDDEN, :].set(w_hh_t)
    packed = packed.at[R_B, :].set(b)
    packed = packed.at[R_WFC:R_WFC + HIDDEN, :OUT_DIM].set(params["w_fc"].T)
    packed = packed.at[R_BFC, :OUT_DIM].set(params["b_fc"])
    return packed


@jax.jit
def load_prediction_forward(x, packed):
    """x: (B, T, INPUT_DIM) float32 -> (B, OUT_DIM) float32.
    `packed` = prepare_params(params) (one-time)."""
    B, T, _ = x.shape
    # Pad batch to a multiple of 8 sublanes; larger B amortizes the serial time loop.
    # (On v5e keep BP <= 128 so the recurrent matmul stays a single MXU pass/step.)
    BP = max(8, ((B + 7) // 8) * 8)

    # time-major, batch-padded, flattened to (T*BP, INPUT_DIM); tiny ops, fused by jit
    x_tm = (jnp.zeros((T, BP, INPUT_DIM), jnp.float32)
            .at[:, :B, :].set(jnp.transpose(x, (1, 0, 2)))
            .reshape(T * BP, INPUT_DIM))

    vmem = pl.BlockSpec(memory_space=pltpu.MemorySpace.VMEM)
    out_p = pl.pallas_call(
        make_kernel(T, BP),
        out_shape=jax.ShapeDtypeStruct((BP, OUT_PAD), jnp.float32),
        in_specs=[vmem, vmem],
        out_specs=vmem,
    )(x_tm, packed)
    return out_p[:B, :OUT_DIM]


def reference_forward(x, params):
    """Pure-JAX reference of the PyTorch forward (for correctness check)."""
    B = x.shape[0]
    w_ih, w_hh = params["w_ih"], params["w_hh"]
    b = params["b_ih"] + params["b_hh"]

    def step(carry, x_t):
        h, c = carry
        gates = x_t @ w_ih.T + h @ w_hh.T + b
        i_g = jax.nn.sigmoid(gates[:, 0 * HIDDEN:1 * HIDDEN])
        f_g = jax.nn.sigmoid(gates[:, 1 * HIDDEN:2 * HIDDEN])
        g_g = jnp.tanh(gates[:, 2 * HIDDEN:3 * HIDDEN])
        o_g = jax.nn.sigmoid(gates[:, 3 * HIDDEN:4 * HIDDEN])
        c = f_g * c + i_g * g_g
        h = o_g * jnp.tanh(c)
        return (h, c), None

    h0 = jnp.zeros((B, HIDDEN), jnp.float32)
    c0 = jnp.zeros((B, HIDDEN), jnp.float32)
    (h_last, _), _ = lax.scan(step, (h0, c0), jnp.transpose(x, (1, 0, 2)))
    return jax.nn.sigmoid(h_last @ params["w_fc"].T + params["b_fc"])


def init_params(key):
    """Deterministic params matching PyTorch shapes (uniform(-k, k), k=1/sqrt(H))."""
    k = 1.0 / jnp.sqrt(jnp.float32(HIDDEN))
    keys = jax.random.split(key, 6)
    u = lambda kk, shape: jax.random.uniform(kk, shape, jnp.float32, -k, k)
    return {
        "w_ih": u(keys[0], (4 * HIDDEN, INPUT_DIM)),  # lstm.weight_ih_l0
        "w_hh": u(keys[1], (4 * HIDDEN, HIDDEN)),     # lstm.weight_hh_l0
        "b_ih": u(keys[2], (4 * HIDDEN,)),            # lstm.bias_ih_l0
        "b_hh": u(keys[3], (4 * HIDDEN,)),            # lstm.bias_hh_l0
        "w_fc": u(keys[4], (OUT_DIM, HIDDEN)),        # fc.weight
        "b_fc": u(keys[5], (OUT_DIM,)),               # fc.bias
    }


if __name__ == "__main__":
    key = jax.random.PRNGKey(0)
    k_in, k_par = jax.random.split(key)

    B, T = 2, 8
    x = jax.random.normal(k_in, (B, T, INPUT_DIM), jnp.float32)
    params = init_params(k_par)
    packed = prepare_params(params)   # one-time param prep (hoisted out of the call)

    out = load_prediction_forward(x, packed)
    out = jax.block_until_ready(out)

    ref = reference_forward(x, params)
    assert out.shape == (B, OUT_DIM)
    assert jnp.allclose(out, ref, atol=1e-5, rtol=1e-5)
    print("KERNEL_OK")
</pallas_src>

<mosaic_0001>
module attributes {stable_mosaic.version = 11 : i64} {
  func.func @kernel(%arg0: memref<64x4xf32, #tpu.memory_space<vmem>>, %arg1: memref<88x128xf32, #tpu.memory_space<vmem>>, %arg2: memref<8x128xf32, #tpu.memory_space<vmem>>) attributes {dimension_semantics = [], scalar_prefetch = 0 : i64, scratch_operands = 0 : i64, tpu.core_type = #tpu.core_type<tc>} {
    %c0 = arith.constant 0 : index
    %c0_0 = arith.constant 0 : index
    %0 = vector.load %arg1[%c0, %c0_0] : memref<88x128xf32, #tpu.memory_space<vmem>>, vector<4x128xf32>
    %c8 = arith.constant 8 : index
    %c0_1 = arith.constant 0 : index
    %1 = vector.load %arg1[%c8, %c0_1] : memref<88x128xf32, #tpu.memory_space<vmem>>, vector<32x128xf32>
    %c40 = arith.constant 40 : index
    %c0_2 = arith.constant 0 : index
    %2 = vector.load %arg1[%c40, %c0_2] : memref<88x128xf32, #tpu.memory_space<vmem>>, vector<1x128xf32>
    %c48 = arith.constant 48 : index
    %c0_3 = arith.constant 0 : index
    %3 = vector.load %arg1[%c48, %c0_3] : memref<88x128xf32, #tpu.memory_space<vmem>>, vector<32x128xf32>
    %c80 = arith.constant 80 : index
    %c0_4 = arith.constant 0 : index
    %4 = vector.load %arg1[%c80, %c0_4] : memref<88x128xf32, #tpu.memory_space<vmem>>, vector<1x128xf32>
    %c0_5 = arith.constant 0 : index
    %c0_6 = arith.constant 0 : index
    %5 = vector.load %arg0[%c0_5, %c0_6] : memref<64x4xf32, #tpu.memory_space<vmem>>, vector<64x4xf32>
    %cst = arith.constant dense<0.000000e+00> : vector<64x128xf32>
    %6 = tpu.matmul %5, %0, %cst {dimension_numbers = #tpu.dot_dimension_numbers<[1], [0], [0], [1], [0, 0, 1, 1], [], []>} : vector<64x4xf32>, vector<4x128xf32>, vector<64x128xf32> -> vector<64x128xf32>
    %7 = vector.broadcast %2 : vector<1x128xf32> to vector<64x128xf32>
    %8 = arith.addf %6, %7 : vector<64x128xf32>
    %cst_7 = arith.constant 0.000000e+00 : f32
    %9 = vector.broadcast %cst_7 : f32 to vector<8x32xf32>
    %cst_8 = arith.constant 0.000000e+00 : f32
    %10 = vector.broadcast %cst_8 : f32 to vector<8x32xf32>
    %11 = vector.extract_strided_slice %8 {offsets = [0, 0], sizes = [8, 128], strides = [1, 1]} : vector<64x128xf32> to vector<8x128xf32>
    %cst_9 = arith.constant dense<0.000000e+00> : vector<8x128xf32>
    %12 = tpu.matmul %9, %1, %cst_9 {dimension_numbers = #tpu.dot_dimension_numbers<[1], [0], [0], [1], [0, 0, 1, 1], [], []>} : vector<8x32xf32>, vector<32x128xf32>, vector<8x128xf32> -> vector<8x128xf32>
    %13 = arith.addf %11, %12 : vector<8x128xf32>
    %14 = arith.negf %13 : vector<8x128xf32>
    %15 = math.exp %14 : vector<8x128xf32>
    %cst_10 = arith.constant 1.000000e+00 : f32
    %16 = vector.broadcast %cst_10 : f32 to vector<8x128xf32>
    %17 = arith.addf %16, %15 : vector<8x128xf32>
    %18 = arith.divf %16, %17 : vector<8x128xf32>
    %19 = vector.extract_strided_slice %18 {offsets = [0, 0], sizes = [8, 32], strides = [1, 1]} : vector<8x128xf32> to vector<8x32xf32>
    %20 = vector.extract_strided_slice %18 {offsets = [0, 32], sizes = [8, 32], strides = [1, 1]} : vector<8x128xf32> to vector<8x32xf32>
    %21 = vector.extract_strided_slice %18 {offsets = [0, 64], sizes = [8, 32], strides = [1, 1]} : vector<8x128xf32> to vector<8x32xf32>
    %cst_11 = arith.constant 2.000000e+00 : f32
    %22 = vector.broadcast %cst_11 : f32 to vector<8x32xf32>
    %23 = arith.mulf %22, %21 : vector<8x32xf32>
    %cst_12 = arith.constant 1.000000e+00 : f32
    %24 = vector.broadcast %cst_12 : f32 to vector<8x32xf32>
    %25 = arith.subf %23, %24 : vector<8x32xf32>
    %26 = vector.extract_strided_slice %18 {offsets = [0, 96], sizes = [8, 32], strides = [1, 1]} : vector<8x128xf32> to vector<8x32xf32>
    %27 = arith.mulf %20, %10 : vector<8x32xf32>
    %28 = arith.mulf %19, %25 : vector<8x32xf32>
    %29 = arith.addf %27, %28 : vector<8x32xf32>
    %30 = math.tanh %29 : vector<8x32xf32>
    %31 = arith.mulf %26, %30 : vector<8x32xf32>
    %32 = vector.extract_strided_slice %8 {offsets = [8, 0], sizes = [8, 128], strides = [1, 1]} : vector<64x128xf32> to vector<8x128xf32>
    %cst_13 = arith.constant dense<0.000000e+00> : vector<8x128xf32>
    %33 = tpu.matmul %31, %1, %cst_13 {dimension_numbers = #tpu.dot_dimension_numbers<[1], [0], [0], [1], [0, 0, 1, 1], [], []>} : vector<8x32xf32>, vector<32x128xf32>, vector<8x128xf32> -> vector<8x128xf32>
    %34 = arith.addf %32, %33 : vector<8x128xf32>
    %35 = arith.negf %34 : vector<8x128xf32>
    %36 = math.exp %35 : vector<8x128xf32>
    %cst_14 = arith.constant 1.000000e+00 : f32
    %37 = vector.broadcast %cst_14 : f32 to vector<8x128xf32>
    %38 = arith.addf %37, %36 : vector<8x128xf32>
    %39 = arith.divf %37, %38 : vector<8x128xf32>
    %40 = vector.extract_strided_slice %39 {offsets = [0, 0], sizes = [8, 32], strides = [1, 1]} : vector<8x128xf32> to vector<8x32xf32>
    %41 = vector.extract_strided_slice %39 {offsets = [0, 32], sizes = [8, 32], strides = [1, 1]} : vector<8x128xf32> to vector<8x32xf32>
    %42 = vector.extract_strided_slice %39 {offsets = [0, 64], sizes = [8, 32], strides = [1, 1]} : vector<8x128xf32> to vector<8x32xf32>
    %cst_15 = arith.constant 2.000000e+00 : f32
    %43 = vector.broadcast %cst_15 : f32 to vector<8x32xf32>
    %44 = arith.mulf %43, %42 : vector<8x32xf32>
    %cst_16 = arith.constant 1.000000e+00 : f32
    %45 = vector.broadcast %cst_16 : f32 to vector<8x32xf32>
    %46 = arith.subf %44, %45 : vector<8x32xf32>
    %47 = vector.extract_strided_slice %39 {offsets = [0, 96], sizes = [8, 32], strides = [1, 1]} : vector<8x128xf32> to vector<8x32xf32>
    %48 = arith.mulf %41, %29 : vector<8x32xf32>
    %49 = arith.mulf %40, %46 : vector<8x32xf32>
    %50 = arith.addf %48, %49 : vector<8x32xf32>
    %51 = math.tanh %50 : vector<8x32xf32>
    %52 = arith.mulf %47, %51 : vector<8x32xf32>
    %53 = vector.extract_strided_slice %8 {offsets = [16, 0], sizes = [8, 128], strides = [1, 1]} : vector<64x128xf32> to vector<8x128xf32>
    %cst_17 = arith.constant dense<0.000000e+00> : vector<8x128xf32>
    %54 = tpu.matmul %52, %1, %cst_17 {dimension_numbers = #tpu.dot_dimension_numbers<[1], [0], [0], [1], [0, 0, 1, 1], [], []>} : vector<8x32xf32>, vector<32x128xf32>, vector<8x128xf32> -> vector<8x128xf32>
    %55 = arith.addf %53, %54 : vector<8x128xf32>
    %56 = arith.negf %55 : vector<8x128xf32>
    %57 = math.exp %56 : vector<8x128xf32>
    %cst_18 = arith.constant 1.000000e+00 : f32
    %58 = vector.broadcast %cst_18 : f32 to vector<8x128xf32>
    %59 = arith.addf %58, %57 : vector<8x128xf32>
    %60 = arith.divf %58, %59 : vector<8x128xf32>
    %61 = vector.extract_strided_slice %60 {offsets = [0, 0], sizes = [8, 32], strides = [1, 1]} : vector<8x128xf32> to vector<8x32xf32>
    %62 = vector.extract_strided_slice %60 {offsets = [0, 32], sizes = [8, 32], strides = [1, 1]} : vector<8x128xf32> to vector<8x32xf32>
    %63 = vector.extract_strided_slice %60 {offsets = [0, 64], sizes = [8, 32], strides = [1, 1]} : vector<8x128xf32> to vector<8x32xf32>
    %cst_19 = arith.constant 2.000000e+00 : f32
    %64 = vector.broadcast %cst_19 : f32 to vector<8x32xf32>
    %65 = arith.mulf %64, %63 : vector<8x32xf32>
    %cst_20 = arith.constant 1.000000e+00 : f32
    %66 = vector.broadcast %cst_20 : f32 to vector<8x32xf32>
    %67 = arith.subf %65, %66 : vector<8x32xf32>
    %68 = vector.extract_strided_slice %60 {offsets = [0, 96], sizes = [8, 32], strides = [1, 1]} : vector<8x128xf32> to vector<8x32xf32>
    %69 = arith.mulf %62, %50 : vector<8x32xf32>
    %70 = arith.mulf %61, %67 : vector<8x32xf32>
    %71 = arith.addf %69, %70 : vector<8x32xf32>
    %72 = math.tanh %71 : vector<8x32xf32>
    %73 = arith.mulf %68, %72 : vector<8x32xf32>
    %74 = vector.extract_strided_slice %8 {offsets = [24, 0], sizes = [8, 128], strides = [1, 1]} : vector<64x128xf32> to vector<8x128xf32>
    %cst_21 = arith.constant dense<0.000000e+00> : vector<8x128xf32>
    %75 = tpu.matmul %73, %1, %cst_21 {dimension_numbers = #tpu.dot_dimension_numbers<[1], [0], [0], [1], [0, 0, 1, 1], [], []>} : vector<8x32xf32>, vector<32x128xf32>, vector<8x128xf32> -> vector<8x128xf32>
    %76 = arith.addf %74, %75 : vector<8x128xf32>
    %77 = arith.negf %76 : vector<8x128xf32>
    %78 = math.exp %77 : vector<8x128xf32>
    %cst_22 = arith.constant 1.000000e+00 : f32
    %79 = vector.broadcast %cst_22 : f32 to vector<8x128xf32>
    %80 = arith.addf %79, %78 : vector<8x128xf32>
    %81 = arith.divf %79, %80 : vector<8x128xf32>
    %82 = vector.extract_strided_slice %81 {offsets = [0, 0], sizes = [8, 32], strides = [1, 1]} : vector<8x128xf32> to vector<8x32xf32>
    %83 = vector.extract_strided_slice %81 {offsets = [0, 32], sizes = [8, 32], strides = [1, 1]} : vector<8x128xf32> to vector<8x32xf32>
    %84 = vector.extract_strided_slice %81 {offsets = [0, 64], sizes = [8, 32], strides = [1, 1]} : vector<8x128xf32> to vector<8x32xf32>
    %cst_23 = arith.constant 2.000000e+00 : f32
    %85 = vector.broadcast %cst_23 : f32 to vector<8x32xf32>
    %86 = arith.mulf %85, %84 : vector<8x32xf32>
    %cst_24 = arith.constant 1.000000e+00 : f32
    %87 = vector.broadcast %cst_24 : f32 to vector<8x32xf32>
    %88 = arith.subf %86, %87 : vector<8x32xf32>
    %89 = vector.extract_strided_slice %81 {offsets = [0, 96], sizes = [8, 32], strides = [1, 1]} : vector<8x128xf32> to vector<8x32xf32>
    %90 = arith.mulf %83, %71 : vector<8x32xf32>
    %91 = arith.mulf %82, %88 : vector<8x32xf32>
    %92 = arith.addf %90, %91 : vector<8x32xf32>
    %93 = math.tanh %92 : vector<8x32xf32>
    %94 = arith.mulf %89, %93 : vector<8x32xf32>
    %95 = vector.extract_strided_slice %8 {offsets = [32, 0], sizes = [8, 128], strides = [1, 1]} : vector<64x128xf32> to vector<8x128xf32>
    %cst_25 = arith.constant dense<0.000000e+00> : vector<8x128xf32>
    %96 = tpu.matmul %94, %1, %cst_25 {dimension_numbers = #tpu.dot_dimension_numbers<[1], [0], [0], [1], [0, 0, 1, 1], [], []>} : vector<8x32xf32>, vector<32x128xf32>, vector<8x128xf32> -> vector<8x128xf32>
    %97 = arith.addf %95, %96 : vector<8x128xf32>
    %98 = arith.negf %97 : vector<8x128xf32>
    %99 = math.exp %98 : vector<8x128xf32>
    %cst_26 = arith.constant 1.000000e+00 : f32
    %100 = vector.broadcast %cst_26 : f32 to vector<8x128xf32>
    %101 = arith.addf %100, %99 : vector<8x128xf32>
    %102 = arith.divf %100, %101 : vector<8x128xf32>
    %103 = vector.extract_strided_slice %102 {offsets = [0, 0], sizes = [8, 32], strides = [1, 1]} : vector<8x128xf32> to vector<8x32xf32>
    %104 = vector.extract_strided_slice %102 {offsets = [0, 32], sizes = [8, 32], strides = [1, 1]} : vector<8x128xf32> to vector<8x32xf32>
    %105 = vector.extract_strided_slice %102 {offsets = [0, 64], sizes = [8, 32], strides = [1, 1]} : vector<8x128xf32> to vector<8x32xf32>
    %cst_27 = arith.constant 2.000000e+00 : f32
    %106 = vector.broadcast %cst_27 : f32 to vector<8x32xf32>
    %107 = arith.mulf %106, %105 : vector<8x32xf32>
    %cst_28 = arith.constant 1.000000e+00 : f32
    %108 = vector.broadcast %cst_28 : f32 to vector<8x32xf32>
    %109 = arith.subf %107, %108 : vector<8x32xf32>
    %110 = vector.extract_strided_slice %102 {offsets = [0, 96], sizes = [8, 32], strides = [1, 1]} : vector<8x128xf32> to vector<8x32xf32>
    %111 = arith.mulf %104, %92 : vector<8x32xf32>
    %112 = arith.mulf %103, %109 : vector<8x32xf32>
    %113 = arith.addf %111, %112 : vector<8x32xf32>
    %114 = math.tanh %113 : vector<8x32xf32>
    %115 = arith.mulf %110, %114 : vector<8x32xf32>
    %116 = vector.extract_strided_slice %8 {offsets = [40, 0], sizes = [8, 128], strides = [1, 1]} : vector<64x128xf32> to vector<8x128xf32>
    %cst_29 = arith.constant dense<0.000000e+00> : vector<8x128xf32>
    %117 = tpu.matmul %115, %1, %cst_29 {dimension_numbers = #tpu.dot_dimension_numbers<[1], [0], [0], [1], [0, 0, 1, 1], [], []>} : vector<8x32xf32>, vector<32x128xf32>, vector<8x128xf32> -> vector<8x128xf32>
    %118 = arith.addf %116, %117 : vector<8x128xf32>
    %119 = arith.negf %118 : vector<8x128xf32>
    %120 = math.exp %119 : vector<8x128xf32>
    %cst_30 = arith.constant 1.000000e+00 : f32
    %121 = vector.broadcast %cst_30 : f32 to vector<8x128xf32>
    %122 = arith.addf %121, %120 : vector<8x128xf32>
    %123 = arith.divf %121, %122 : vector<8x128xf32>
    %124 = vector.extract_strided_slice %123 {offsets = [0, 0], sizes = [8, 32], strides = [1, 1]} : vector<8x128xf32> to vector<8x32xf32>
    %125 = vector.extract_strided_slice %123 {offsets = [0, 32], sizes = [8, 32], strides = [1, 1]} : vector<8x128xf32> to vector<8x32xf32>
    %126 = vector.extract_strided_slice %123 {offsets = [0, 64], sizes = [8, 32], strides = [1, 1]} : vector<8x128xf32> to vector<8x32xf32>
    %cst_31 = arith.constant 2.000000e+00 : f32
    %127 = vector.broadcast %cst_31 : f32 to vector<8x32xf32>
    %128 = arith.mulf %127, %126 : vector<8x32xf32>
    %cst_32 = arith.constant 1.000000e+00 : f32
    %129 = vector.broadcast %cst_32 : f32 to vector<8x32xf32>
    %130 = arith.subf %128, %129 : vector<8x32xf32>
    %131 = vector.extract_strided_slice %123 {offsets = [0, 96], sizes = [8, 32], strides = [1, 1]} : vector<8x128xf32> to vector<8x32xf32>
    %132 = arith.mulf %125, %113 : vector<8x32xf32>
    %133 = arith.mulf %124, %130 : vector<8x32xf32>
    %134 = arith.addf %132, %133 : vector<8x32xf32>
    %135 = math.tanh %134 : vector<8x32xf32>
    %136 = arith.mulf %131, %135 : vector<8x32xf32>
    %137 = vector.extract_strided_slice %8 {offsets = [48, 0], sizes = [8, 128], strides = [1, 1]} : vector<64x128xf32> to vector<8x128xf32>
    %cst_33 = arith.constant dense<0.000000e+00> : vector<8x128xf32>
    %138 = tpu.matmul %136, %1, %cst_33 {dimension_numbers = #tpu.dot_dimension_numbers<[1], [0], [0], [1], [0, 0, 1, 1], [], []>} : vector<8x32xf32>, vector<32x128xf32>, vector<8x128xf32> -> vector<8x128xf32>
    %139 = arith.addf %137, %138 : vector<8x128xf32>
    %140 = arith.negf %139 : vector<8x128xf32>
    %141 = math.exp %140 : vector<8x128xf32>
    %cst_34 = arith.constant 1.000000e+00 : f32
    %142 = vector.broadcast %cst_34 : f32 to vector<8x128xf32>
    %143 = arith.addf %142, %141 : vector<8x128xf32>
    %144 = arith.divf %142, %143 : vector<8x128xf32>
    %145 = vector.extract_strided_slice %144 {offsets = [0, 0], sizes = [8, 32], strides = [1, 1]} : vector<8x128xf32> to vector<8x32xf32>
    %146 = vector.extract_strided_slice %144 {offsets = [0, 32], sizes = [8, 32], strides = [1, 1]} : vector<8x128xf32> to vector<8x32xf32>
    %147 = vector.extract_strided_slice %144 {offsets = [0, 64], sizes = [8, 32], strides = [1, 1]} : vector<8x128xf32> to vector<8x32xf32>
    %cst_35 = arith.constant 2.000000e+00 : f32
    %148 = vector.broadcast %cst_35 : f32 to vector<8x32xf32>
    %149 = arith.mulf %148, %147 : vector<8x32xf32>
    %cst_36 = arith.constant 1.000000e+00 : f32
    %150 = vector.broadcast %cst_36 : f32 to vector<8x32xf32>
    %151 = arith.subf %149, %150 : vector<8x32xf32>
    %152 = vector.extract_strided_slice %144 {offsets = [0, 96], sizes = [8, 32], strides = [1, 1]} : vector<8x128xf32> to vector<8x32xf32>
    %153 = arith.mulf %146, %134 : vector<8x32xf32>
    %154 = arith.mulf %145, %151 : vector<8x32xf32>
    %155 = arith.addf %153, %154 : vector<8x32xf32>
    %156 = math.tanh %155 : vector<8x32xf32>
    %157 = arith.mulf %152, %156 : vector<8x32xf32>
    %158 = vector.extract_strided_slice %8 {offsets = [56, 0], sizes = [8, 128], strides = [1, 1]} : vector<64x128xf32> to vector<8x128xf32>
    %cst_37 = arith.constant dense<0.000000e+00> : vector<8x128xf32>
    %159 = tpu.matmul %157, %1, %cst_37 {dimension_numbers = #tpu.dot_dimension_numbers<[1], [0], [0], [1], [0, 0, 1, 1], [], []>} : vector<8x32xf32>, vector<32x128xf32>, vector<8x128xf32> -> vector<8x128xf32>
    %160 = arith.addf %158, %159 : vector<8x128xf32>
    %161 = arith.negf %160 : vector<8x128xf32>
    %162 = math.exp %161 : vector<8x128xf32>
    %cst_38 = arith.constant 1.000000e+00 : f32
    %163 = vector.broadcast %cst_38 : f32 to vector<8x128xf32>
    %164 = arith.addf %163, %162 : vector<8x128xf32>
    %165 = arith.divf %163, %164 : vector<8x128xf32>
    %166 = vector.extract_strided_slice %165 {offsets = [0, 0], sizes = [8, 32], strides = [1, 1]} : vector<8x128xf32> to vector<8x32xf32>
    %167 = vector.extract_strided_slice %165 {offsets = [0, 32], sizes = [8, 32], strides = [1, 1]} : vector<8x128xf32> to vector<8x32xf32>
    %168 = vector.extract_strided_slice %165 {offsets = [0, 64], sizes = [8, 32], strides = [1, 1]} : vector<8x128xf32> to vector<8x32xf32>
    %cst_39 = arith.constant 2.000000e+00 : f32
    %169 = vector.broadcast %cst_39 : f32 to vector<8x32xf32>
    %170 = arith.mulf %169, %168 : vector<8x32xf32>
    %cst_40 = arith.constant 1.000000e+00 : f32
    %171 = vector.broadcast %cst_40 : f32 to vector<8x32xf32>
    %172 = arith.subf %170, %171 : vector<8x32xf32>
    %173 = vector.extract_strided_slice %165 {offsets = [0, 96], sizes = [8, 32], strides = [1, 1]} : vector<8x128xf32> to vector<8x32xf32>
    %174 = arith.mulf %167, %155 : vector<8x32xf32>
    %175 = arith.mulf %166, %172 : vector<8x32xf32>
    %176 = arith.addf %174, %175 : vector<8x32xf32>
    %177 = math.tanh %176 : vector<8x32xf32>
    %178 = arith.mulf %173, %177 : vector<8x32xf32>
    %cst_41 = arith.constant dense<0.000000e+00> : vector<8x128xf32>
    %179 = tpu.matmul %178, %3, %cst_41 {dimension_numbers = #tpu.dot_dimension_numbers<[1], [0], [0], [1], [0, 0, 1, 1], [], []>} : vector<8x32xf32>, vector<32x128xf32>, vector<8x128xf32> -> vector<8x128xf32>
    %180 = vector.broadcast %4 : vector<1x128xf32> to vector<8x128xf32>
    %181 = arith.addf %179, %180 : vector<8x128xf32>
    %182 = arith.negf %181 : vector<8x128xf32>
    %183 = math.exp %182 : vector<8x128xf32>
    %cst_42 = arith.constant 1.000000e+00 : f32
    %184 = vector.broadcast %cst_42 : f32 to vector<8x128xf32>
    %185 = arith.addf %184, %183 : vector<8x128xf32>
    %186 = arith.divf %184, %185 : vector<8x128xf32>
    %c0_43 = arith.constant 0 : index
    %c0_44 = arith.constant 0 : index
    %187 = vector.load %arg2[%c0_43, %c0_44] : memref<8x128xf32, #tpu.memory_space<vmem>>, vector<8x128xf32>
    tpu.vector_store %arg2[%c0_43, %c0_44], %186 {strides = array<i32>} : memref<8x128xf32, #tpu.memory_space<vmem>>, vector<8x128xf32>,
    return
  }
}

</mosaic_0001>

<bundles_post_ra>
// kernel: load_prediction_forward.1
= control target key start
LH: loop header
LB: loop body
LE: loop exit
PB: predicated region body
PF: predicated region fallthrough
CT: control target
= control target key end

     0   :  { %vm56_vm0 = vcmask 1043456   ;;  %vm31_vm1 = vcmask 31744   ;;  %v755_v7 = vmov 0.0   ;;  %s756_s25 = smov 64   ;;  %s757_s26 = smov 32   ;;  %vm101_vm6 = vcmask 261120   ;;  %s940_s1 = inlined_call_operand.vmem [shape: f32[88,128], index: 1, kind: input, shape index: {}]   ;;  %s941_s0 = inlined_call_operand.vmem [shape: f32[64,4], index: 0, kind: input, shape index: {}]   ;;  %s942_s2 = inlined_call_operand.vmem [shape: f32[8,128], index: 2, kind: output, shape index: {}]  }
   0x1   :  { %v11_v0 = vld [vmem:[%s940_s1] sm:$0xf]  ;;  %v27_v1 = vld [vmem:[%s941_s0 + $0x28] sm:$0xff]  ;;  %v791_v4 = vld [vmem:[%s940_s1 + $0x18] sm:$0xff] }
   0x2   :  { %v782_v2 = vld [vmem:[%s940_s1 + $0x20] sm:$0xff]  ;;  %696 = vmatpush.msk.msra.mxu1 %vm56_vm0, %v11_v0  ;;  %662 = vmatpush.msk.msra.mxu0 %vm56_vm0, %v11_v0  ;;  %v798_v5 = vld [vmem:[%s940_s1 + $0x10] sm:$0xff]  ;;  %v806_v6 = vld [vmem:[%s940_s1 + $0x8] sm:$0xff] }
   0x3   :  { %v22_v3 = vld [vmem:[%s941_s0] sm:$0xff]  ;;  %668 = vmatmul.msk.f32.vlgmr.msra.gmra.mxu1 %vm31_vm1, %v27_v1  ;;  %697 = vmatpush.msk.msra.mxu2 %vm56_vm0, %v11_v0  ;;  %v833_v10 = vld [vmem:[%s940_s1 + $0x28] ss:$0 sm:$0xff]  ;;  %v28_v35 = vld [vmem:[%s941_s0 + $0x30] sm:$0xff] }
   0x4   :  { %663 = vmatmul.msk.f32.vlgmr.msra.gmra.mxu0 %vm31_vm1, %v22_v3  ;;  %117 = vmatpush.msrb.mxu1 %v782_v2  ;;  %v29_v36 = vld [vmem:[%s941_s0 + $0x38] sm:$0xff]  ;;  %v23_v39 = vld [vmem:[%s941_s0 + $0x8] sm:$0xff] }
   0x5   :  { %181 = vmatpush.msrb.mxu2 %v782_v2  ;;  %245 = vmatpush.msra.mxu3 %v782_v2 }
   0x6   :  { %118 = vmatpush.msrb.mxu1 %v791_v4  ;;  %669 = vmatmul.msk.f32.vlgmr.msra.gmra.mxu2 %vm31_vm1, %v28_v35  ;;  %v25_v35 = vld [vmem:[%s941_s0 + $0x18] sm:$0xff] }
   0x7   :  { %182 = vmatpush.msrb.mxu2 %v791_v4  ;;  %246 = vmatpush.msra.mxu3 %v791_v4 }
   0x8   :  { %119 = vmatpush.msrb.mxu1 %v798_v5 }
   0x9   :  { %183 = vmatpush.msrb.mxu2 %v798_v5  ;;  %247 = vmatpush.msra.mxu3 %v798_v5 }
   0xa   :  { %120 = vmatpush.msrb.mxu1 %v806_v6 }
   0xb   :  { %121 = vmatmul.f32.vlgmr.msrb.gmra.mxu1 %v755_v7  ;;  %184 = vmatpush.msrb.mxu2 %v806_v6 }
   0xc   :  { %248 = vmatpush.msra.mxu3 %v806_v6  ;;  %309 = vmatpush.msra.mxu1 %v782_v2 }
   0xd   :  { %373 = vmatpush.msra.mxu2 %v782_v2  ;;  %664 = vmatmul.msk.f32.gmra.mxu0 %vm31_vm1, %v23_v39 }
   0xe   :  { %437 = vmatpush.msrb.mxu3 %v782_v2  ;;  %310 = vmatpush.msra.mxu1 %v791_v4 }
   0xf   :  { %374 = vmatpush.msra.mxu2 %v791_v4 }
  0x10   :  { %438 = vmatpush.msrb.mxu3 %v791_v4  ;;  %311 = vmatpush.msra.mxu1 %v798_v5 }
  0x11   :  { %375 = vmatpush.msra.mxu2 %v798_v5 }
  0x12   :  { %439 = vmatpush.msrb.mxu3 %v798_v5  ;;  %312 = vmatpush.msra.mxu1 %v806_v6 }
  0x13   :  { %376 = vmatpush.msra.mxu2 %v806_v6 }
  0x14   :  { %440 = vmatpush.msrb.mxu3 %v806_v6  ;;  %501 = vmatpush.msrb.mxu1 %v782_v2 }
  0x15   :  { %670 = vmatmul.msk.f32.gmra.mxu2 %vm31_vm1, %v29_v36 }
  0x16   :  { %502 = vmatpush.msrb.mxu1 %v791_v4 }
  0x18   :  { %503 = vmatpush.msrb.mxu1 %v798_v5 }
  0x1a   :  { %504 = vmatpush.msrb.mxu1 %v806_v6 }
  0x80   :  { %v828_v8 = vpop.f32.mrf.mxu1 }
  0x81   :  { %v77_v9 = vpop.f32.mrf.mxu0 }
  0x82   :  { %v78_v11 = vadd.f32 %v833_v10, %v77_v9 }
  0x88   :  { %v122_v12 = vpop.f32.mrf.mxu1 }
  0x89   :  { %v125_v13 = vadd.f32 %v122_v12, %v78_v11  ;;  %v861_v41 = vpop.f32.mrf.mxu2 }
  0x8a   :  { %v80_v43 = vpop.f32.mrf.mxu0 }
  0x8b   :  { %v671_v14 = vmul.f32 -1.442695, %v125_v13  ;;  %v81_v44 = vadd.f32 %v833_v10, %v80_v43 }
  0x8d   :  { %703 = vpow2.f32 %v671_v14 }
  0x93   :  { %v704_v15 = vpop.eup %703 }
  0x94   :  { %v129_v16 = vadd.f32 1.0, %v704_v15 }
  0x96   :  { %705 = vrcp.f32 %v129_v16  ;;  %v141_v20 = vand.u32 2147483648, %v129_v16  ;;  %v139_v22 = vand.u32 2147483647, %v129_v16  ;;  %vm135_vm3 = vweird.f32 %v129_v16 }
  0x98   :  { %v142_v24 = vor.u32 1.1754944e-38, %v141_v20  ;;  %vm140_vm5 = vcmp.eq.f32.partialorder %v139_v22, 8.507059e+37  ;;  %v863_v42 = vpop.f32.mrf.mxu2 }
  0x9c   :  { %v706_v17 = vpop.eup %705 }
  0x9d   :  { %v131_v18 = vmul.f32 %v706_v17, %v129_v16  ;;  %vm136_vm2 = vweird.f32 %v706_v17 }
  0x9e   :  { %vm137_vm4 = vmor %vm135_vm3, %vm136_vm2 }
  0x9f   :  { %v132_v19 = vsub.f32 1.0, %v131_v18 }
  0xa1   :  { %v133_v21 = vmul.f32 %v706_v17, %v132_v19 }
  0xa3   :  { %v134_v23 = vadd.f32 %v706_v17, %v133_v21 }
  0xa5   :  { %v138_v25 = vsel %vm137_vm4, %v706_v17, %v134_v23 }
  0xa6   :  { %v143_v26 = vsel %vm140_vm5, %v142_v24, %v138_v25 }
  0xa7   :  { %v145_v27 = vmul.f32 2.0, %v143_v26  ;;  %v147_v31 = vmul.f32 0.0, %v143_v26 }
  0xa9   :  { %v672_v28 = vadd.f32 -1.0, %v145_v27 }
  0xab   :  { %149 = vrot.lane.b32.xlu0 %v672_v28, %s756_s25 }
 0x11d   :  { %v150_v29 = vpop.permute.xlu0 %149 }
 0x11e   :  { %v152_v30 = vmul.f32 %v150_v29, %v143_v26 }
 0x120   :  { %154 = vrot.lane.b32.xlu0 %v152_v30, %s757_s26 }
 0x192   :  { %v155_v32 = vpop.permute.xlu0 %154 }
 0x193   :  { %v157_v33 = vadd.f32 %v155_v32, %v147_v31 }
 0x195   :  { %707 = vtanh.f32 %v157_v33 }
 0x19b   :  { %v708_v34 = vpop.eup %707 }
 0x19c   :  { %160 = vrot.lane.b32.xlu1 %v708_v34, %s756_s25 }
 0x20e   :  { %v161_v37 = vpop.permute.xlu1 %160 }
 0x20f   :  { %v163_v38 = vmul.f32 %v161_v37, %v143_v26 }
 0x211   :  { %165 = vrot.lane.b32.xlu1 %v163_v38, %s757_s26 }
 0x283   :  { %v166_v40 = vpop.permute.xlu1 %165 }
 0x284   :  { %673 = vmatmul.msk.f32.vlgmr.msrb.gmra.mxu2 %vm101_vm6, %v166_v40 }
 0x285   :  { %565 = vmatpush.msrb.mxu2 %v782_v2 }
 0x287   :  { %566 = vmatpush.msrb.mxu2 %v791_v4 }
 0x289   :  { %567 = vmatpush.msrb.mxu2 %v798_v5 }
 0x28b   :  { %568 = vmatpush.msrb.mxu2 %v806_v6  ;;  %v24_v6 = vld [vmem:[%s941_s0 + $0x10] sm:$0xff] }
 0x28c   :  { %665 = vmatmul.msk.f32.gmra.mxu0 %vm31_vm1, %v24_v6 }
 0x294   :  { %666 = vmatmul.msk.f32.gmra.mxu0 %vm31_vm1, %v25_v35 }
 0x307   :  { %v186_v45 = vpop.f32.mrf.mxu2 }
 0x308   :  { %v189_v46 = vadd.f32 %v186_v45, %v81_v44 }
 0x309   :  { %v83_v9 = vpop.f32.mrf.mxu0 }
 0x30a   :  { %v674_v47 = vmul.f32 -1.442695, %v189_v46  ;;  %v84_v11 = vadd.f32 %v833_v10, %v83_v9 }
 0x30c   :  { %709 = vpow2.f32 %v674_v47 }
 0x311   :  { %v86_v39 = vpop.f32.mrf.mxu0 }
 0x312   :  { %v710_v48 = vpop.eup %709  ;;  %v87_v40 = vadd.f32 %v833_v10, %v86_v39 }
 0x313   :  { %v193_v49 = vadd.f32 1.0, %v710_v48 }
 0x315   :  { %711 = vrcp.f32 %v193_v49  ;;  %v205_v53 = vand.u32 2147483648, %v193_v49  ;;  %v203_v55 = vand.u32 2147483647, %v193_v49  ;;  %vm199_vm8 = vweird.f32 %v193_v49 }
 0x317   :  { %v206_v57 = vor.u32 1.1754944e-38, %v205_v53  ;;  %vm204_vm10 = vcmp.eq.f32.partialorder %v203_v55, 8.507059e+37 }
 0x31b   :  { %v712_v50 = vpop.eup %711 }
 0x31c   :  { %v195_v51 = vmul.f32 %v712_v50, %v193_v49  ;;  %vm200_vm7 = vweird.f32 %v712_v50 }
 0x31d   :  { %vm201_vm9 = vmor %vm199_vm8, %vm200_vm7 }
 0x31e   :  { %v196_v52 = vsub.f32 1.0, %v195_v51 }
 0x320   :  { %v197_v54 = vmul.f32 %v712_v50, %v196_v52 }
 0x322   :  { %v198_v56 = vadd.f32 %v712_v50, %v197_v54 }
 0x324   :  { %v202_v58 = vsel %vm201_vm9, %v712_v50, %v198_v56 }
 0x325   :  { %v207_v59 = vsel %vm204_vm10, %v206_v57, %v202_v58 }
 0x326   :  { %v209_v60 = vmul.f32 2.0, %v207_v59  ;;  %v211_v0 = vmul.f32 %v207_v59, %v157_v33 }
 0x328   :  { %v675_v61 = vadd.f32 -1.0, %v209_v60 }
 0x32a   :  { %213 = vrot.lane.b32.xlu2 %v675_v61, %s756_s25 }
 0x384   :  { %v214_v62 = vpop.permute.xlu2 %213 }
 0x385   :  { %v216_v63 = vmul.f32 %v214_v62, %v207_v59 }
 0x387   :  { %218 = vrot.lane.b32.xlu2 %v216_v63, %s757_s26 }
 0x3e1   :  { %v219_v1 = vpop.permute.xlu2 %218 }
 0x3e2   :  { %v221_v2 = vadd.f32 %v219_v1, %v211_v0 }
 0x3e4   :  { %713 = vtanh.f32 %v221_v2 }
 0x3ea   :  { %v714_v3 = vpop.eup %713 }
 0x3eb   :  { %224 = vrot.lane.b32.xlu0 %v714_v3, %s756_s25 }
 0x45d   :  { %v225_v4 = vpop.permute.xlu0 %224 }
 0x45e   :  { %v227_v5 = vmul.f32 %v225_v4, %v207_v59  ;;  %v26_v4 = vld [vmem:[%s941_s0 + $0x20] sm:$0xff] }
 0x45f   :  { %667 = vmatmul.msk.f32.gmra.mxu0 %vm31_vm1, %v26_v4 }
 0x460   :  { %229 = vrot.lane.b32.xlu1 %v227_v5, %s757_s26 }
 0x4d2   :  { %v230_v7 = vpop.permute.xlu1 %229 }
 0x4d3   :  { %676 = vmatmul.msk.f32.vlgmr.msra.gmra.mxu3 %vm101_vm6, %v230_v7 }
 0x4dc   :  { %v89_v6 = vpop.f32.mrf.mxu0 }
 0x4dd   :  { %v90_v7 = vadd.f32 %v833_v10, %v89_v6 }
 0x556   :  { %v250_v12 = vpop.f32.mrf.mxu3 }
 0x557   :  { %v253_v13 = vadd.f32 %v250_v12, %v84_v11 }
 0x559   :  { %v677_v14 = vmul.f32 -1.442695, %v253_v13 }
 0x55b   :  { %715 = vpow2.f32 %v677_v14 }
 0x561   :  { %v716_v15 = vpop.eup %715 }
 0x562   :  { %v257_v16 = vadd.f32 1.0, %v716_v15 }
 0x564   :  { %717 = vrcp.f32 %v257_v16  ;;  %v269_v20 = vand.u32 2147483648, %v257_v16  ;;  %v267_v22 = vand.u32 2147483647, %v257_v16  ;;  %vm263_vm12 = vweird.f32 %v257_v16 }
 0x566   :  { %v270_v24 = vor.u32 1.1754944e-38, %v269_v20  ;;  %vm268_vm14 = vcmp.eq.f32.partialorder %v267_v22, 8.507059e+37 }
 0x56a   :  { %v718_v17 = vpop.eup %717 }
 0x56b   :  { %v259_v18 = vmul.f32 %v718_v17, %v257_v16  ;;  %vm264_vm11 = vweird.f32 %v718_v17 }
 0x56c   :  { %vm265_vm13 = vmor %vm263_vm12, %vm264_vm11 }
 0x56d   :  { %v260_v19 = vsub.f32 1.0, %v259_v18 }
 0x56f   :  { %v261_v21 = vmul.f32 %v718_v17, %v260_v19 }
 0x571   :  { %v262_v23 = vadd.f32 %v718_v17, %v261_v21 }
 0x573   :  { %v266_v25 = vsel %vm265_vm13, %v718_v17, %v262_v23 }
 0x574   :  { %v271_v26 = vsel %vm268_vm14, %v270_v24, %v266_v25 }
 0x575   :  { %v273_v27 = vmul.f32 2.0, %v271_v26  ;;  %v275_v31 = vmul.f32 %v271_v26, %v221_v2 }
 0x577   :  { %v678_v28 = vadd.f32 -1.0, %v273_v27 }
 0x579   :  { %277 = vrot.lane.b32.xlu2 %v678_v28, %s756_s25 }
 0x5d3   :  { %v278_v29 = vpop.permute.xlu2 %277 }
 0x5d4   :  { %v280_v30 = vmul.f32 %v278_v29, %v271_v26 }
 0x5d6   :  { %282 = vrot.lane.b32.xlu0 %v280_v30, %s757_s26 }
 0x648   :  { %v283_v32 = vpop.permute.xlu0 %282 }
 0x649   :  { %v285_v33 = vadd.f32 %v283_v32, %v275_v31 }
 0x64b   :  { %719 = vtanh.f32 %v285_v33 }
 0x651   :  { %v720_v34 = vpop.eup %719 }
 0x652   :  { %288 = vrot.lane.b32.xlu1 %v720_v34, %s756_s25 }
 0x6c4   :  { %v289_v36 = vpop.permute.xlu1 %288 }
 0x6c5   :  { %v291_v37 = vmul.f32 %v289_v36, %v271_v26  ;;  %v93_v36 = vadd.f32 %v833_v10, %v828_v8 }
 0x6c7   :  { %293 = vrot.lane.b32.xlu2 %v291_v37, %s757_s26 }
 0x721   :  { %v294_v38 = vpop.permute.xlu2 %293 }
 0x722   :  { %679 = vmatmul.msk.f32.vlgmr.msra.gmra.mxu1 %vm101_vm6, %v294_v38 }
 0x79f   :  { %v314_v43 = vpop.f32.mrf.mxu1 }
 0x7a0   :  { %v317_v44 = vadd.f32 %v314_v43, %v87_v40 }
 0x7a2   :  { %v680_v45 = vmul.f32 -1.442695, %v317_v44 }
 0x7a4   :  { %721 = vpow2.f32 %v680_v45 }
 0x7aa   :  { %v722_v46 = vpop.eup %721 }
 0x7ab   :  { %v321_v47 = vadd.f32 1.0, %v722_v46 }
 0x7ad   :  { %723 = vrcp.f32 %v321_v47  ;;  %v333_v51 = vand.u32 2147483648, %v321_v47  ;;  %v331_v53 = vand.u32 2147483647, %v321_v47  ;;  %vm327_vm0 = vweird.f32 %v321_v47 }
 0x7af   :  { %v334_v55 = vor.u32 1.1754944e-38, %v333_v51  ;;  %vm332_vm3 = vcmp.eq.f32.partialorder %v331_v53, 8.507059e+37 }
 0x7b3   :  { %v724_v48 = vpop.eup %723 }
 0x7b4   :  { %v323_v49 = vmul.f32 %v724_v48, %v321_v47  ;;  %vm328_vm15 = vweird.f32 %v724_v48 }
 0x7b5   :  { %vm329_vm2 = vmor %vm327_vm0, %vm328_vm15 }
 0x7b6   :  { %v324_v50 = vsub.f32 1.0, %v323_v49 }
 0x7b8   :  { %v325_v52 = vmul.f32 %v724_v48, %v324_v50 }
 0x7ba   :  { %v326_v54 = vadd.f32 %v724_v48, %v325_v52 }
 0x7bc   :  { %v330_v56 = vsel %vm329_vm2, %v724_v48, %v326_v54 }
 0x7bd   :  { %v335_v57 = vsel %vm332_vm3, %v334_v55, %v330_v56 }
 0x7be   :  { %v337_v58 = vmul.f32 2.0, %v335_v57  ;;  %v339_v62 = vmul.f32 %v335_v57, %v285_v33 }
 0x7c0   :  { %v681_v59 = vadd.f32 -1.0, %v337_v58 }
 0x7c2   :  { %341 = vrot.lane.b32.xlu0 %v681_v59, %s756_s25 }
 0x834   :  { %v342_v60 = vpop.permute.xlu0 %341 }
 0x835   :  { %v344_v61 = vmul.f32 %v342_v60, %v335_v57 }
 0x837   :  { %346 = vrot.lane.b32.xlu1 %v344_v61, %s757_s26 }
 0x8a9   :  { %v347_v63 = vpop.permute.xlu1 %346 }
 0x8aa   :  { %v349_v0 = vadd.f32 %v347_v63, %v339_v62 }
 0x8ac   :  { %725 = vtanh.f32 %v349_v0 }
 0x8b2   :  { %v726_v1 = vpop.eup %725 }
 0x8b3   :  { %352 = vrot.lane.b32.xlu2 %v726_v1, %s756_s25 }
 0x90d   :  { %v353_v2 = vpop.permute.xlu2 %352 }
 0x90e   :  { %v355_v3 = vmul.f32 %v353_v2, %v335_v57 }
 0x910   :  { %357 = vrot.lane.b32.xlu0 %v355_v3, %s757_s26 }
 0x982   :  { %v358_v5 = vpop.permute.xlu0 %357 }
 0x983   :  { %682 = vmatmul.msk.f32.vlgmr.msra.gmra.mxu2 %vm101_vm6, %v358_v5 }
 0xa06   :  { %v378_v9 = vpop.f32.mrf.mxu2 }
 0xa07   :  { %v381_v11 = vadd.f32 %v378_v9, %v90_v7 }
 0xa09   :  { %v683_v12 = vmul.f32 -1.442695, %v381_v11 }
 0xa0b   :  { %727 = vpow2.f32 %v683_v12 }
 0xa11   :  { %v728_v13 = vpop.eup %727 }
 0xa12   :  { %v385_v14 = vadd.f32 1.0, %v728_v13 }
 0xa14   :  { %729 = vrcp.f32 %v385_v14  ;;  %v397_v18 = vand.u32 2147483648, %v385_v14  ;;  %v395_v20 = vand.u32 2147483647, %v385_v14  ;;  %vm391_vm1 = vweird.f32 %v385_v14 }
 0xa16   :  { %v398_v22 = vor.u32 1.1754944e-38, %v397_v18  ;;  %vm396_vm7 = vcmp.eq.f32.partialorder %v395_v20, 8.507059e+37 }
 0xa1a   :  { %v730_v15 = vpop.eup %729 }
 0xa1b   :  { %v387_v16 = vmul.f32 %v730_v15, %v385_v14  ;;  %vm392_vm4 = vweird.f32 %v730_v15 }
 0xa1c   :  { %vm393_vm5 = vmor %vm391_vm1, %vm392_vm4 }
 0xa1d   :  { %v388_v17 = vsub.f32 1.0, %v387_v16 }
 0xa1f   :  { %v389_v19 = vmul.f32 %v730_v15, %v388_v17 }
 0xa21   :  { %v390_v21 = vadd.f32 %v730_v15, %v389_v19 }
 0xa23   :  { %v394_v23 = vsel %vm393_vm5, %v730_v15, %v390_v21 }
 0xa24   :  { %v399_v24 = vsel %vm396_vm7, %v398_v22, %v394_v23 }
 0xa25   :  { %v401_v25 = vmul.f32 2.0, %v399_v24  ;;  %v403_v29 = vmul.f32 %v399_v24, %v349_v0  ;;  %v96_v0 = vadd.f32 %v833_v10, %v861_v41 }
 0xa27   :  { %v684_v26 = vadd.f32 -1.0, %v401_v25 }
 0xa29   :  { %405 = vrot.lane.b32.xlu1 %v684_v26, %s756_s25 }
 0xa9b   :  { %v406_v27 = vpop.permute.xlu1 %405 }
 0xa9c   :  { %v408_v28 = vmul.f32 %v406_v27, %v399_v24 }
 0xa9e   :  { %410 = vrot.lane.b32.xlu2 %v408_v28, %s757_s26  ;;  %v99_v28 = vadd.f32 %v833_v10, %v863_v42 }
 0xaf8   :  { %v411_v30 = vpop.permute.xlu2 %410 }
 0xaf9   :  { %v413_v31 = vadd.f32 %v411_v30, %v403_v29 }
 0xafb   :  { %731 = vtanh.f32 %v413_v31 }
 0xb01   :  { %v732_v32 = vpop.eup %731 }
 0xb02   :  { %416 = vrot.lane.b32.xlu0 %v732_v32, %s756_s25 }
 0xb74   :  { %v417_v33 = vpop.permute.xlu0 %416 }
 0xb75   :  { %v419_v34 = vmul.f32 %v417_v33, %v399_v24 }
 0xb77   :  { %421 = vrot.lane.b32.xlu1 %v419_v34, %s757_s26 }
 0xbe9   :  { %v422_v35 = vpop.permute.xlu1 %421 }
 0xbea   :  { %685 = vmatmul.msk.f32.vlgmr.msrb.gmra.mxu3 %vm101_vm6, %v422_v35 }
 0xc6d   :  { %v442_v37 = vpop.f32.mrf.mxu3 }
 0xc6e   :  { %v445_v38 = vadd.f32 %v442_v37, %v93_v36 }
 0xc70   :  { %v686_v39 = vmul.f32 -1.442695, %v445_v38 }
 0xc72   :  { %733 = vpow2.f32 %v686_v39 }
 0xc78   :  { %v734_v40 = vpop.eup %733 }
 0xc79   :  { %v449_v43 = vadd.f32 1.0, %v734_v40 }
 0xc7b   :  { %735 = vrcp.f32 %v449_v43  ;;  %v461_v47 = vand.u32 2147483648, %v449_v43  ;;  %v459_v49 = vand.u32 2147483647, %v449_v43  ;;  %vm455_vm9 = vweird.f32 %v449_v43 }
 0xc7d   :  { %v462_v51 = vor.u32 1.1754944e-38, %v461_v47  ;;  %vm460_vm11 = vcmp.eq.f32.partialorder %v459_v49, 8.507059e+37 }
 0xc81   :  { %v736_v44 = vpop.eup %735 }
 0xc82   :  { %v451_v45 = vmul.f32 %v736_v44, %v449_v43  ;;  %vm456_vm8 = vweird.f32 %v736_v44 }
 0xc83   :  { %vm457_vm10 = vmor %vm455_vm9, %vm456_vm8 }
 0xc84   :  { %v452_v46 = vsub.f32 1.0, %v451_v45 }
 0xc86   :  { %v453_v48 = vmul.f32 %v736_v44, %v452_v46 }
 0xc88   :  { %v454_v50 = vadd.f32 %v736_v44, %v453_v48 }
 0xc8a   :  { %v458_v52 = vsel %vm457_vm10, %v736_v44, %v454_v50 }
 0xc8b   :  { %v463_v8 = vsel %vm460_vm11, %v462_v51, %v458_v52  ;;  %v20_v52 = vld [vmem:[%s940_s1 + $0x48] sm:$0xff] }
 0xc8c   :  { %v465_v53 = vmul.f32 2.0, %v463_v8  ;;  %v467_v57 = vmul.f32 %v463_v8, %v413_v31  ;;  %630 = vmatpush.msra.mxu3 %v20_v52 }
 0xc8e   :  { %v687_v54 = vadd.f32 -1.0, %v465_v53  ;;  %v18_v53 = vld [vmem:[%s940_s1 + $0x38] sm:$0xff] }
 0xc90   :  { %469 = vrot.lane.b32.xlu2 %v687_v54, %s756_s25  ;;  %v17_v54 = vld [vmem:[%s940_s1 + $0x30] sm:$0xff] }
 0xcea   :  { %v470_v55 = vpop.permute.xlu2 %469 }
 0xceb   :  { %v472_v56 = vmul.f32 %v470_v55, %v463_v8 }
 0xced   :  { %474 = vrot.lane.b32.xlu0 %v472_v56, %s757_s26 }
 0xd5f   :  { %v475_v58 = vpop.permute.xlu0 %474 }
 0xd60   :  { %v477_v59 = vadd.f32 %v475_v58, %v467_v57  ;;  %v702_v58 = vld [vmem:[%s940_s1 + $0x50] ss:$0 sm:$0xff] }
 0xd62   :  { %737 = vtanh.f32 %v477_v59 }
 0xd68   :  { %v738_v60 = vpop.eup %737 }
 0xd69   :  { %480 = vrot.lane.b32.xlu1 %v738_v60, %s756_s25 }
 0xddb   :  { %v481_v61 = vpop.permute.xlu1 %480 }
 0xddc   :  { %v483_v62 = vmul.f32 %v481_v61, %v463_v8  ;;  %v19_v8 = vld [vmem:[%s940_s1 + $0x40] sm:$0xff] }
 0xddd   :  { %631 = vmatpush.msra.mxu3 %v19_v8 }
 0xdde   :  { %485 = vrot.lane.b32.xlu2 %v483_v62, %s757_s26 }
 0xddf   :  { %632 = vmatpush.msra.mxu3 %v18_v53 }
 0xde1   :  { %633 = vmatpush.msra.mxu3 %v17_v54 }
 0xe38   :  { %v486_v63 = vpop.permute.xlu2 %485 }
 0xe39   :  { %688 = vmatmul.msk.f32.vlgmr.msrb.gmra.mxu1 %vm101_vm6, %v486_v63 }
 0xeb6   :  { %v506_v1 = vpop.f32.mrf.mxu1 }
 0xeb7   :  { %v509_v2 = vadd.f32 %v506_v1, %v96_v0 }
 0xeb9   :  { %v689_v3 = vmul.f32 -1.442695, %v509_v2 }
 0xebb   :  { %739 = vpow2.f32 %v689_v3 }
 0xec1   :  { %v740_v4 = vpop.eup %739 }
 0xec2   :  { %v513_v5 = vadd.f32 1.0, %v740_v4 }
 0xec4   :  { %741 = vrcp.f32 %v513_v5  ;;  %v525_v11 = vand.u32 2147483648, %v513_v5  ;;  %v523_v13 = vand.u32 2147483647, %v513_v5  ;;  %vm519_vm13 = vweird.f32 %v513_v5 }
 0xec6   :  { %v526_v15 = vor.u32 1.1754944e-38, %v525_v11  ;;  %vm524_vm15 = vcmp.eq.f32.partialorder %v523_v13, 8.507059e+37 }
 0xeca   :  { %v742_v6 = vpop.eup %741 }
 0xecb   :  { %v515_v7 = vmul.f32 %v742_v6, %v513_v5  ;;  %vm520_vm12 = vweird.f32 %v742_v6 }
 0xecc   :  { %vm521_vm14 = vmor %vm519_vm13, %vm520_vm12 }
 0xecd   :  { %v516_v9 = vsub.f32 1.0, %v515_v7 }
 0xecf   :  { %v517_v12 = vmul.f32 %v742_v6, %v516_v9 }
 0xed1   :  { %v518_v14 = vadd.f32 %v742_v6, %v517_v12 }
 0xed3   :  { %v522_v16 = vsel %vm521_vm14, %v742_v6, %v518_v14 }
 0xed4   :  { %v527_v41 = vsel %vm524_vm15, %v526_v15, %v522_v16 }
 0xed5   :  { %v529_v17 = vmul.f32 2.0, %v527_v41  ;;  %v531_v21 = vmul.f32 %v527_v41, %v477_v59 }
 0xed7   :  { %v690_v18 = vadd.f32 -1.0, %v529_v17 }
 0xed9   :  { %533 = vrot.lane.b32.xlu0 %v690_v18, %s756_s25 }
 0xf4b   :  { %v534_v19 = vpop.permute.xlu0 %533 }
 0xf4c   :  { %v536_v20 = vmul.f32 %v534_v19, %v527_v41 }
 0xf4e   :  { %538 = vrot.lane.b32.xlu1 %v536_v20, %s757_s26 }
 0xfc0   :  { %v539_v22 = vpop.permute.xlu1 %538 }
 0xfc1   :  { %v541_v23 = vadd.f32 %v539_v22, %v531_v21 }
 0xfc3   :  { %743 = vtanh.f32 %v541_v23 }
 0xfc9   :  { %v744_v24 = vpop.eup %743 }
 0xfca   :  { %544 = vrot.lane.b32.xlu2 %v744_v24, %s756_s25 }
0x1024   :  { %v545_v25 = vpop.permute.xlu2 %544 }
0x1025   :  { %v547_v26 = vmul.f32 %v545_v25, %v527_v41 }
0x1027   :  { %549 = vrot.lane.b32.xlu0 %v547_v26, %s757_s26 }
0x1099   :  { %v550_v27 = vpop.permute.xlu0 %549 }
0x109a   :  { %691 = vmatmul.msk.f32.vlgmr.msrb.gmra.mxu2 %vm101_vm6, %v550_v27 }
0x111d   :  { %v570_v29 = vpop.f32.mrf.mxu2 }
0x111e   :  { %v573_v30 = vadd.f32 %v570_v29, %v99_v28 }
0x1120   :  { %v692_v31 = vmul.f32 -1.442695, %v573_v30 }
0x1122   :  { %745 = vpow2.f32 %v692_v31 }
0x1128   :  { %v746_v32 = vpop.eup %745 }
0x1129   :  { %v577_v33 = vadd.f32 1.0, %v746_v32 }
0x112b   :  { %747 = vrcp.f32 %v577_v33  ;;  %v589_v37 = vand.u32 2147483648, %v577_v33  ;;  %v587_v39 = vand.u32 2147483647, %v577_v33  ;;  %vm583_vm2 = vweird.f32 %v577_v33 }
0x112d   :  { %v590_v43 = vor.u32 1.1754944e-38, %v589_v37  ;;  %vm588_vm4 = vcmp.eq.f32.partialorder %v587_v39, 8.507059e+37 }
0x1131   :  { %v748_v34 = vpop.eup %747 }
0x1132   :  { %v579_v35 = vmul.f32 %v748_v34, %v577_v33  ;;  %vm584_vm0 = vweird.f32 %v748_v34 }
0x1133   :  { %vm585_vm3 = vmor %vm583_vm2, %vm584_vm0 }
0x1134   :  { %v580_v36 = vsub.f32 1.0, %v579_v35 }
0x1136   :  { %v581_v38 = vmul.f32 %v748_v34, %v580_v36 }
0x1138   :  { %v582_v40 = vadd.f32 %v748_v34, %v581_v38 }
0x113a   :  { %v586_v44 = vsel %vm585_vm3, %v748_v34, %v582_v40 }
0x113b   :  { %v591_v10 = vsel %vm588_vm4, %v590_v43, %v586_v44 }
0x113c   :  { %v593_v42 = vmul.f32 2.0, %v591_v10  ;;  %v595_v48 = vmul.f32 %v591_v10, %v541_v23 }
0x113e   :  { %v693_v45 = vadd.f32 -1.0, %v593_v42 }
0x1140   :  { %597 = vrot.lane.b32.xlu1 %v693_v45, %s756_s25 }
0x11b2   :  { %v598_v46 = vpop.permute.xlu1 %597 }
0x11b3   :  { %v600_v47 = vmul.f32 %v598_v46, %v591_v10 }
0x11b5   :  { %602 = vrot.lane.b32.xlu2 %v600_v47, %s757_s26 }
0x120f   :  { %v603_v49 = vpop.permute.xlu2 %602 }
0x1210   :  { %v605_v50 = vadd.f32 %v603_v49, %v595_v48 }
0x1212   :  { %749 = vtanh.f32 %v605_v50 }
0x1218   :  { %v750_v51 = vpop.eup %749 }
0x1219   :  { %608 = vrot.lane.b32.xlu0 %v750_v51, %s756_s25 }
0x128b   :  { %v609_v55 = vpop.permute.xlu0 %608 }
0x128c   :  { %v611_v56 = vmul.f32 %v609_v55, %v591_v10 }
0x128e   :  { %614 = vrot.lane.b32.xlu1 %v611_v56, %s757_s26 }
0x1300   :  { %v615_v57 = vpop.permute.xlu1 %614 }
0x1301   :  { %694 = vmatmul.msk.f32.vlgmr.msra.gmra.mxu3 %vm101_vm6, %v615_v57 }
0x1384   :  { %v635_v59 = vpop.f32.mrf.mxu3 }
0x1385   :  { %v636_v60 = vadd.f32 %v702_v58, %v635_v59 }
0x1387   :  { %v695_v61 = vmul.f32 -1.442695, %v636_v60 }
0x1389   :  { %751 = vpow2.f32 %v695_v61 }
0x138f   :  { %v752_v62 = vpop.eup %751 }
0x1390   :  { %v641_v63 = vadd.f32 1.0, %v752_v62 }
0x1392   :  { %753 = vrcp.f32 %v641_v63  ;;  %v653_v3 = vand.u32 2147483648, %v641_v63  ;;  %v651_v5 = vand.u32 2147483647, %v641_v63  ;;  %vm647_vm6 = vweird.f32 %v641_v63 }
0x1394   :  { %v654_v7 = vor.u32 1.1754944e-38, %v653_v3  ;;  %vm652_vm7 = vcmp.eq.f32.partialorder %v651_v5, 8.507059e+37 }
0x1398   :  { %v754_v0 = vpop.eup %753 }
0x1399   :  { %v643_v1 = vmul.f32 %v754_v0, %v641_v63  ;;  %vm648_vm1 = vweird.f32 %v754_v0 }
0x139a   :  { %vm649_vm5 = vmor %vm647_vm6, %vm648_vm1 }
0x139b   :  { %v644_v2 = vsub.f32 1.0, %v643_v1 }
0x139d   :  { %v645_v4 = vmul.f32 %v754_v0, %v644_v2 }
0x139f   :  { %v646_v6 = vadd.f32 %v754_v0, %v645_v4 }
0x13a1   :  { %v650_v9 = vsel %vm649_vm5, %v754_v0, %v646_v6 }
0x13a2   :  { %v655_v11 = vsel %vm652_vm7, %v654_v7, %v650_v9 }
0x13a3   :  { %657 = vst [vmem:[%s942_s2] sm:$0xff] %v655_v11 }

</bundles_post_ra>
